<compile_context>
chip_gen: v7x
topology: tpu7x:2x2x1
jax: 0.10.0
libtpu: 0.0.40
codegen_flags: <defaults>
</compile_context>

<pallas_src>
import functools

import jax
import jax.numpy as jnp
from jax.experimental import pallas as pl
from jax.experimental.pallas import tpu as pltpu


FEAT_PAD = 128          # lane-dense hidden width (vreg lane count)
DEFAULT_TB = 1024       # batch tile (rows) per grid step (multiple of 16)


def _round_up(x, m):
    return ((x + m - 1) // m) * m


def _default_act_dtype():
    """bf16 tanh epilogue on v6e/v7x (bf16 EUP); f32 on v5e and older."""
    try:
        kind = jax.devices()[0].device_kind.lower()
    except Exception:
        return jnp.float32
    for old in ("v2", "v3", "v4", "v5"):
        if old in kind:
            return jnp.float32
    return jnp.bfloat16


# ----------------------------- Pallas kernel ------------------------------ #

def _fused_mlp_kernel(*refs, num_hidden, matmul_dtype, act_dtype):
    """Fused MLP over one batch tile.

    refs (num_hidden > 0):
      x_ref  (TB, Kp)        bf16  input tile
      w0_ref (Kp, 128)       bf16  fc0 weight (hidden zero-padded to 128)
      b0_ref (1, 128)        f32   fc0 bias
      wh_ref (L, 128, 128)   bf16  stacked hidden weights
      bh_ref (L, 1, 128)     f32   stacked hidden biases
      wo_ref (128, O)        bf16  fout weight
      bo_ref (1, O)          f32   fout bias
      o_ref  (TB, O)         f32   output tile
    """
    if num_hidden > 0:
        x_ref, w0_ref, b0_ref, wh_ref, bh_ref, wo_ref, bo_ref, o_ref = refs
    else:
        x_ref, w0_ref, b0_ref, wo_ref, bo_ref, o_ref = refs
        wh_ref = bh_ref = None

    # fc0: MXU matmul (bf16 in, f32 accum), f32 bias, tanh in act_dtype (EUP).
    y = jnp.dot(x_ref[...], w0_ref[...], preferred_element_type=jnp.float32)
    y = y + b0_ref[...]
    h = jnp.tanh(y.astype(act_dtype))

    for l in range(num_hidden):                 # static unroll (L is small)
        y = jnp.dot(h.astype(matmul_dtype), wh_ref[l],
                    preferred_element_type=jnp.float32)
        y = y + bh_ref[l]
        h = jnp.tanh(y.astype(act_dtype))

    # fout: narrow N == output_size, no tanh.
    out = jnp.dot(h.astype(matmul_dtype), wo_ref[...],
                  preferred_element_type=jnp.float32)
    out = out + bo_ref[...]
    o_ref[...] = out.astype(o_ref.dtype)


# ------------------------------ FC_net model ------------------------------ #

def init_fc_net_params(key, hidden_size, num_layers, input_size, output_size):
    """Parameters matching nn.Linear default init
    (uniform(-1/sqrt(fan_in), 1/sqrt(fan_in))).  Weights stored as
    [in_features, out_features] so each layer is y = x @ W + b."""
    dims = [(input_size, hidden_size)]
    dims += [(hidden_size, hidden_size)] * num_layers
    dims += [(hidden_size, output_size)]

    params = []
    for (fan_in, fan_out) in dims:
        key, kw, kb = jax.random.split(key, 3)
        bound = 1.0 / jnp.sqrt(jnp.float32(fan_in))
        w = jax.random.uniform(kw, (fan_in, fan_out), jnp.float32,
                               minval=-bound, maxval=bound)
        b = jax.random.uniform(kb, (1, fan_out), jnp.float32,
                               minval=-bound, maxval=bound)
        params.append((w, b))
    return params


def pack_fc_net_params(params, feat_pad=FEAT_PAD, w_dtype=jnp.bfloat16):
    """Pad / stack / cast weights ONCE (hoisted out of the forward pass).

    Zero padding is exact: padded weight rows/cols and biases are 0 and
    tanh(0) == 0, so padded hidden lanes carry exact zeros through every layer.
    """
    (w0, b0) = params[0]
    hidden = params[1:-1]
    (wo, bo) = params[-1]

    input_size, hidden_size = w0.shape
    output_size = wo.shape[1]
    k_pad = _round_up(input_size, 16)           # bf16-friendly sublane count

    w0p = (jnp.zeros((k_pad, feat_pad), jnp.float32)
           .at[:input_size, :hidden_size].set(w0).astype(w_dtype))
    b0p = jnp.zeros((1, feat_pad), jnp.float32).at[:, :hidden_size].set(b0[0])

    if hidden:
        whp = jnp.stack([
            jnp.zeros((feat_pad, feat_pad), jnp.float32)
            .at[:hidden_size, :hidden_size].set(w) for (w, _) in hidden
        ]).astype(w_dtype)                                  # (L, 128, 128)
        bhp = jnp.stack([
            jnp.zeros((1, feat_pad), jnp.float32)
            .at[:, :hidden_size].set(b[0]) for (_, b) in hidden
        ])                                                  # (L, 1, 128)
    else:
        whp = bhp = None

    wop = (jnp.zeros((feat_pad, output_size), jnp.float32)
           .at[:hidden_size, :].set(wo).astype(w_dtype))
    bop = bo.astype(jnp.float32)

    return dict(w0=w0p, b0=b0p, wh=whp, bh=bhp, wo=wop, bo=bop,
                input_size=input_size, k_pad=k_pad,
                hidden_size=hidden_size, output_size=output_size,
                num_hidden=len(hidden))


def fc_net_forward_pallas(packed, t, *, tb=DEFAULT_TB, feat_pad=FEAT_PAD,
                          act_dtype=None):
    """Fused FC_net forward: tanh(Linear) x (num_layers+1), then Linear."""
    if act_dtype is None:
        act_dtype = _default_act_dtype()
    matmul_dtype = packed["w0"].dtype

    B, K = t.shape
    assert K == packed["input_size"], (K, packed["input_size"])
    k_pad = packed["k_pad"]
    out_size = packed["output_size"]
    num_hidden = packed["num_hidden"]

    # Batch tiling: multiple of 16 (bf16 sublane pairs).  Give the "parallel"
    # batch axis at least 2 grid steps when there is enough batch (v7x: 2 TCs).
    b16 = _round_up(max(B, 1), 16)
    tile_b = _round_up(min(tb, b16), 16)
    if b16 // tile_b < 2 and b16 >= 32:
        tile_b = _round_up((b16 + 1) // 2, 16)
    b_pad = _round_up(b16, tile_b)

    # Input is cast to bf16 in the wrapper; only tiny batch/feature padding
    # (to b_pad x k_pad) is materialized — no 128-lane f32 slab in HBM.
    if b_pad == B and k_pad == K:
        xp = t.astype(matmul_dtype)
    else:
        xp = (jnp.zeros((b_pad, k_pad), matmul_dtype)
              .at[:B, :K].set(t.astype(matmul_dtype)))

    in_specs = [
        pl.BlockSpec((tile_b, k_pad), lambda i: (i, 0)),        # input tile
        pl.BlockSpec((k_pad, feat_pad), lambda i: (0, 0)),      # fc0 W (resident)
        pl.BlockSpec((1, feat_pad), lambda i: (0, 0)),          # fc0 b
    ]
    args = [xp, packed["w0"], packed["b0"]]
    if num_hidden > 0:
        in_specs += [
            pl.BlockSpec((num_hidden, feat_pad, feat_pad), lambda i: (0, 0, 0)),
            pl.BlockSpec((num_hidden, 1, feat_pad), lambda i: (0, 0, 0)),
        ]
        args += [packed["wh"], packed["bh"]]
    in_specs += [
        pl.BlockSpec((feat_pad, out_size), lambda i: (0, 0)),   # fout W
        pl.BlockSpec((1, out_size), lambda i: (0, 0)),          # fout b
    ]
    args += [packed["wo"], packed["bo"]]

    weight_bytes = sum(int(a.size) * a.dtype.itemsize for a in args[1:])
    cost = pl.CostEstimate(
        flops=2 * b_pad * (k_pad * feat_pad
                           + num_hidden * feat_pad * feat_pad
                           + feat_pad * out_size),
        transcendentals=b_pad * feat_pad * (num_hidden + 1),
        bytes_accessed=int(xp.size) * xp.dtype.itemsize
                       + weight_bytes
                       + b_pad * out_size * 4,
    )

    kernel = functools.partial(_fused_mlp_kernel,
                               num_hidden=num_hidden,
                               matmul_dtype=matmul_dtype,
                               act_dtype=act_dtype)

    out = pl.pallas_call(
        kernel,
        out_shape=jax.ShapeDtypeStruct((b_pad, out_size), jnp.float32),
        grid=(b_pad // tile_b,),
        in_specs=in_specs,
        out_specs=pl.BlockSpec((tile_b, out_size), lambda i: (i, 0)),
        compiler_params=pltpu.CompilerParams(
            dimension_semantics=("parallel",),        # megacore on v7x
            vmem_limit_bytes=32 * 1024 * 1024,
        ),
        cost_estimate=cost,
    )(*args)

    return out if b_pad == B else out[:B]


# Pure-JAX reference mirroring the kernel's numerics (bf16 MXU inputs,
# f32 accumulation / bias, tanh in act_dtype).
def fc_net_reference(params, t, matmul_dtype=jnp.bfloat16,
                     act_dtype=jnp.float32):
    h = t.astype(matmul_dtype)
    for (w, b) in params[:-1]:
        y = jnp.dot(h, w.astype(matmul_dtype),
                    preferred_element_type=jnp.float32) + b
        h = jnp.tanh(y.astype(act_dtype)).astype(matmul_dtype)
    w, b = params[-1]
    return jnp.dot(h, w.astype(matmul_dtype),
                   preferred_element_type=jnp.float32) + b


# --------------------------------- main ----------------------------------- #

if __name__ == "__main__":
    # Small shapes consistent with the module: FC_net(hidden_size=32,
    # num_layers=3, input_size=4, output_size=2), batch of 8.
    hidden_size, num_layers, input_size, output_size = 32, 3, 4, 2
    batch = 8

    key = jax.random.PRNGKey(0)
    key, kparams, kx = jax.random.split(key, 3)

    params = init_fc_net_params(kparams, hidden_size, num_layers,
                                input_size, output_size)
    t = jax.random.normal(kx, (batch, input_size), jnp.float32)

    packed = pack_fc_net_params(params)       # pack/pad/cast ONCE (hoisted)
    act_dtype = _default_act_dtype()          # bf16 tanh on v6e/v7x, f32 on v5e

    out = fc_net_forward_pallas(packed, t, act_dtype=act_dtype)
    out = jax.block_until_ready(out)

    ref = fc_net_reference(params, t, act_dtype=act_dtype)
    assert out.shape == (batch, output_size), out.shape
    assert jnp.allclose(out, ref, atol=2e-2, rtol=2e-2), (
        "mismatch vs reference:\n%s\n%s" % (out, ref))

    print("KERNEL_OK")
</pallas_src>

<mosaic_0001>
module attributes {stable_mosaic.version = 11 : i64} {
  func.func @_fused_mlp_kernel(%arg0: i32, %arg1: memref<16x16xbf16, #tpu.memory_space<vmem>>, %arg2: memref<16x128xbf16, #tpu.memory_space<vmem>>, %arg3: memref<1x128xf32, #tpu.memory_space<vmem>>, %arg4: memref<3x128x128xbf16, #tpu.memory_space<vmem>>, %arg5: memref<3x1x128xf32, #tpu.memory_space<vmem>>, %arg6: memref<128x2xbf16, #tpu.memory_space<vmem>>, %arg7: memref<1x2xf32, #tpu.memory_space<vmem>>, %arg8: memref<16x2xf32, #tpu.memory_space<vmem>>) attributes {dimension_semantics = [#tpu.dimension_semantics<parallel>], iteration_bounds = array<i64: 1>, scalar_prefetch = 0 : i64, scratch_operands = 0 : i64, tpu.core_type = #tpu.core_type<tc>, window_params = [{transform_indices = @transform_0, window_bounds = array<i64: 16, 16>}, {pipeline_mode = #tpu.pipeline_mode<synchronous>, transform_indices = @transform_1, window_bounds = array<i64: 16, 128>}, {pipeline_mode = #tpu.pipeline_mode<synchronous>, transform_indices = @transform_2, window_bounds = array<i64: 1, 128>}, {pipeline_mode = #tpu.pipeline_mode<synchronous>, transform_indices = @transform_3, window_bounds = array<i64: 3, 128, 128>}, {pipeline_mode = #tpu.pipeline_mode<synchronous>, transform_indices = @transform_4, window_bounds = array<i64: 3, 1, 128>}, {pipeline_mode = #tpu.pipeline_mode<synchronous>, transform_indices = @transform_5, window_bounds = array<i64: 128, 2>}, {pipeline_mode = #tpu.pipeline_mode<synchronous>, transform_indices = @transform_6, window_bounds = array<i64: 1, 2>}, {transform_indices = @transform_7, window_bounds = array<i64: 16, 2>}]} {
    %c0 = arith.constant 0 : index
    %c0_0 = arith.constant 0 : index
    %0 = vector.load %arg1[%c0, %c0_0] : memref<16x16xbf16, #tpu.memory_space<vmem>>, vector<16x16xbf16>
    %c0_1 = arith.constant 0 : index
    %c0_2 = arith.constant 0 : index
    %1 = vector.load %arg2[%c0_1, %c0_2] : memref<16x128xbf16, #tpu.memory_space<vmem>>, vector<16x128xbf16>
    %cst = arith.constant dense<0.000000e+00> : vector<16x128xf32>
    %2 = tpu.matmul %0, %1, %cst {dimension_numbers = #tpu.dot_dimension_numbers<[1], [0], [0], [1], [0, 0, 1, 1], [], []>} : vector<16x16xbf16>, vector<16x128xbf16>, vector<16x128xf32> -> vector<16x128xf32>
    %c0_3 = arith.constant 0 : index
    %c0_4 = arith.constant 0 : index
    %3 = vector.load %arg3[%c0_3, %c0_4] : memref<1x128xf32, #tpu.memory_space<vmem>>, vector<1x128xf32>
    %4 = vector.broadcast %3 : vector<1x128xf32> to vector<16x128xf32>
    %5 = arith.addf %2, %4 : vector<16x128xf32>
    %6 = arith.truncf %5 : vector<16x128xf32> to vector<16x128xbf16>
    %7 = math.tanh %6 : vector<16x128xbf16>
    %c0_5 = arith.constant 0 : index
    %c0_6 = arith.constant 0 : index
    %c0_7 = arith.constant 0 : index
    %8 = vector.load %arg4[%c0_5, %c0_6, %c0_7] : memref<3x128x128xbf16, #tpu.memory_space<vmem>>, vector<1x128x128xbf16>
    %9 = vector.shape_cast %8 : vector<1x128x128xbf16> to vector<128x128xbf16>
    %cst_8 = arith.constant dense<0.000000e+00> : vector<16x128xf32>
    %10 = tpu.matmul %7, %9, %cst_8 {dimension_numbers = #tpu.dot_dimension_numbers<[1], [0], [0], [1], [0, 0, 1, 1], [], []>} : vector<16x128xbf16>, vector<128x128xbf16>, vector<16x128xf32> -> vector<16x128xf32>
    %c0_9 = arith.constant 0 : index
    %c0_10 = arith.constant 0 : index
    %c0_11 = arith.constant 0 : index
    %11 = vector.load %arg5[%c0_9, %c0_10, %c0_11] : memref<3x1x128xf32, #tpu.memory_space<vmem>>, vector<1x1x128xf32>
    %12 = vector.shape_cast %11 : vector<1x1x128xf32> to vector<1x128xf32>
    %13 = vector.broadcast %12 : vector<1x128xf32> to vector<16x128xf32>
    %14 = arith.addf %10, %13 : vector<16x128xf32>
    %15 = arith.truncf %14 : vector<16x128xf32> to vector<16x128xbf16>
    %16 = math.tanh %15 : vector<16x128xbf16>
    %c1 = arith.constant 1 : index
    %c0_12 = arith.constant 0 : index
    %c0_13 = arith.constant 0 : index
    %17 = vector.load %arg4[%c1, %c0_12, %c0_13] : memref<3x128x128xbf16, #tpu.memory_space<vmem>>, vector<1x128x128xbf16>
    %18 = vector.shape_cast %17 : vector<1x128x128xbf16> to vector<128x128xbf16>
    %cst_14 = arith.constant dense<0.000000e+00> : vector<16x128xf32>
    %19 = tpu.matmul %16, %18, %cst_14 {dimension_numbers = #tpu.dot_dimension_numbers<[1], [0], [0], [1], [0, 0, 1, 1], [], []>} : vector<16x128xbf16>, vector<128x128xbf16>, vector<16x128xf32> -> vector<16x128xf32>
    %c1_15 = arith.constant 1 : index
    %c0_16 = arith.constant 0 : index
    %c0_17 = arith.constant 0 : index
    %20 = vector.load %arg5[%c1_15, %c0_16, %c0_17] : memref<3x1x128xf32, #tpu.memory_space<vmem>>, vector<1x1x128xf32>
    %21 = vector.shape_cast %20 : vector<1x1x128xf32> to vector<1x128xf32>
    %22 = vector.broadcast %21 : vector<1x128xf32> to vector<16x128xf32>
    %23 = arith.addf %19, %22 : vector<16x128xf32>
    %24 = arith.truncf %23 : vector<16x128xf32> to vector<16x128xbf16>
    %25 = math.tanh %24 : vector<16x128xbf16>
    %c2 = arith.constant 2 : index
    %c0_18 = arith.constant 0 : index
    %c0_19 = arith.constant 0 : index
    %26 = vector.load %arg4[%c2, %c0_18, %c0_19] : memref<3x128x128xbf16, #tpu.memory_space<vmem>>, vector<1x128x128xbf16>
    %27 = vector.shape_cast %26 : vector<1x128x128xbf16> to vector<128x128xbf16>
    %cst_20 = arith.constant dense<0.000000e+00> : vector<16x128xf32>
    %28 = tpu.matmul %25, %27, %cst_20 {dimension_numbers = #tpu.dot_dimension_numbers<[1], [0], [0], [1], [0, 0, 1, 1], [], []>} : vector<16x128xbf16>, vector<128x128xbf16>, vector<16x128xf32> -> vector<16x128xf32>
    %c2_21 = arith.constant 2 : index
    %c0_22 = arith.constant 0 : index
    %c0_23 = arith.constant 0 : index
    %29 = vector.load %arg5[%c2_21, %c0_22, %c0_23] : memref<3x1x128xf32, #tpu.memory_space<vmem>>, vector<1x1x128xf32>
    %30 = vector.shape_cast %29 : vector<1x1x128xf32> to vector<1x128xf32>
    %31 = vector.broadcast %30 : vector<1x128xf32> to vector<16x128xf32>
    %32 = arith.addf %28, %31 : vector<16x128xf32>
    %33 = arith.truncf %32 : vector<16x128xf32> to vector<16x128xbf16>
    %34 = math.tanh %33 : vector<16x128xbf16>
    %c0_24 = arith.constant 0 : index
    %c0_25 = arith.constant 0 : index
    %35 = vector.load %arg6[%c0_24, %c0_25] : memref<128x2xbf16, #tpu.memory_space<vmem>>, vector<128x2xbf16>
    %cst_26 = arith.constant dense<0.000000e+00> : vector<16x2xf32>
    %36 = tpu.matmul %34, %35, %cst_26 {dimension_numbers = #tpu.dot_dimension_numbers<[1], [0], [0], [1], [0, 0, 1, 1], [], []>} : vector<16x128xbf16>, vector<128x2xbf16>, vector<16x2xf32> -> vector<16x2xf32>
    %c0_27 = arith.constant 0 : index
    %c0_28 = arith.constant 0 : index
    %37 = vector.load %arg7[%c0_27, %c0_28] : memref<1x2xf32, #tpu.memory_space<vmem>>, vector<1x2xf32>
    %38 = vector.broadcast %37 : vector<1x2xf32> to vector<16x2xf32>
    %39 = arith.addf %36, %38 : vector<16x2xf32>
    %c0_29 = arith.constant 0 : index
    %c0_30 = arith.constant 0 : index
    %40 = vector.load %arg8[%c0_29, %c0_30] : memref<16x2xf32, #tpu.memory_space<vmem>>, vector<16x2xf32>
    tpu.vector_store %arg8[%c0_29, %c0_30], %39 {strides = array<i32>} : memref<16x2xf32, #tpu.memory_space<vmem>>, vector<16x2xf32>,
    return
  }
  func.func @transform_0(%arg0: i32) -> (i32, i32) {
    %c0_i32 = arith.constant 0 : i32
    %c0_i32_0 = arith.constant 0 : i32
    return %arg0, %c0_i32 : i32, i32
  }
  func.func @transform_1(%arg0: i32) -> (i32, i32) {
    %c0_i32 = arith.constant 0 : i32
    %c0_i32_0 = arith.constant 0 : i32
    %c0_i32_1 = arith.constant 0 : i32
    return %c0_i32, %c0_i32_0 : i32, i32
  }
  func.func @transform_2(%arg0: i32) -> (i32, i32) {
    %c0_i32 = arith.constant 0 : i32
    %c0_i32_0 = arith.constant 0 : i32
    %c0_i32_1 = arith.constant 0 : i32
    return %c0_i32, %c0_i32_0 : i32, i32
  }
  func.func @transform_3(%arg0: i32) -> (i32, i32, i32) {
    %c0_i32 = arith.constant 0 : i32
    %c0_i32_0 = arith.constant 0 : i32
    %c0_i32_1 = arith.constant 0 : i32
    %c0_i32_2 = arith.constant 0 : i32
    return %c0_i32, %c0_i32_0, %c0_i32_1 : i32, i32, i32
  }
  func.func @transform_4(%arg0: i32) -> (i32, i32, i32) {
    %c0_i32 = arith.constant 0 : i32
    %c0_i32_0 = arith.constant 0 : i32
    %c0_i32_1 = arith.constant 0 : i32
    %c0_i32_2 = arith.constant 0 : i32
    return %c0_i32, %c0_i32_0, %c0_i32_1 : i32, i32, i32
  }
  func.func @transform_5(%arg0: i32) -> (i32, i32) {
    %c0_i32 = arith.constant 0 : i32
    %c0_i32_0 = arith.constant 0 : i32
    %c0_i32_1 = arith.constant 0 : i32
    return %c0_i32, %c0_i32_0 : i32, i32
  }
  func.func @transform_6(%arg0: i32) -> (i32, i32) {
    %c0_i32 = arith.constant 0 : i32
    %c0_i32_0 = arith.constant 0 : i32
    %c0_i32_1 = arith.constant 0 : i32
    return %c0_i32, %c0_i32_0 : i32, i32
  }
  func.func @transform_7(%arg0: i32) -> (i32, i32) {
    %c0_i32 = arith.constant 0 : i32
    %c0_i32_0 = arith.constant 0 : i32
    return %arg0, %c0_i32 : i32, i32
  }
}

</mosaic_0001>

<bundles_post_ra>
// kernel: tpu_custom_call.1
= control target key start
LH: loop header
LB: loop body
LE: loop exit
PB: predicated region body
PF: predicated region fallthrough
CT: control target
= control target key end

     0   :  { %12 = vsyncpa [#allocation3], 0  ;;  %s813_s24 = smov [#allocation2]   ;;  %s964_s0 = inlined_call_operand.vmem [shape: bf16[16,16], index: 0, kind: input, shape index: {}]   ;;  %s965_s1 = inlined_call_operand.vmem [shape: bf16[16,128], index: 1, kind: input, shape index: {}]   ;;  %s966_s2 = inlined_call_operand.vmem [shape: f32[1,128], index: 2, kind: input, shape index: {}]   ;;  %s967_s3 = inlined_call_operand.hbm [shape: bf16[3,128,128], index: 3, kind: input, shape index: {}]   ;;  %s968_s4 = inlined_call_operand.vmem [shape: f32[3,1,128], index: 4, kind: input, shape index: {}]   ;;  %s969_s5 = inlined_call_operand.vmem [shape: bf16[128,2], index: 5, kind: input, shape index: {}]   ;;  %s970_s6 = inlined_call_operand.vmem [shape: f32[1,2], index: 6, kind: input, shape index: {}]   ;;  %s971_s7 = inlined_call_operand.vmem [shape: f32[16,2], index: 7, kind: output, shape index: {}]  }
   0x1   :  { %s24_s25 = sshll.u32 %s813_s24, 4  ;;  %s789_s28 = scalar_lea.hbm %s967_s3, 3072  ;;  %s25_s25 = int_to_ptr.vmem [resolvable:$true] %s24_s25 }
   0x2   :  { %p790_p0 = scmp.ne.s32.totalorder %s967_s3, %s789_s28  ;;  %p793_p1 = scmp.lt.u32.totalorder %s789_s28, %s967_s3 }
   0x4   :  { %p795_p2 = pnand %p793_p1, %p790_p0 }
   0x6   :  { %798 = shalt.err (!%p795_p2)
}
   0x7   :  { %s799_s10 = scalar_lea.vmem %s25_s25, 3072  ;;  %p804_p4 = scmp.lt.s32.totalorder %s25_s25, %s25_s25 }
   0x8   :  { %p800_p3 = scmp.ne.s32.totalorder %s25_s25, %s799_s10  ;;  %p805_p5 = scmp.lt.s32.totalorder %s799_s10, %s799_s10 }
   0xa   :  { %p806_p6 = por %p805_p5, %p804_p4 }
   0xc   :  { %p807_p7 = pnand %p806_p6, %p800_p3 }
   0xe   :  { %810 = shalt.err (!%p807_p7)
}
   0xf   :  { %s814_s11 = smov 64   ;;  %s815_s12 = smov 4  }
  0x10   :  { %30 = dma.hbm_to_vmem [thread:$0]  %s967_s3, 3072, %s25_s25, [#allocation3], %s814_s11, %s814_s11, %s815_s12  }
  0x11   :  { %811 = dma.done.wait [#allocation3], 3072  }
  0x12   :  { %812 = vsyncadd [#allocation3], 4294964224  ;;  %v816_v0 = vmov 0.0   ;;  %vm817_vm0 = vmmov 0   ;;  %v747_v1 = vld [vmem:[%s965_s1] sm:$0xff]   ;;  %vm63_vm1 = vcmask 130048  }
  0x13   :  { %656 = vmatprep.subr.bf16.mxu0 %v816_v0  ;;  %658 = vmatprep.mubr.msk.bf16.mxu0 %vm817_vm0, %v816_v0  ;;  %v748_v2 = vld [vmem:[%s964_s0] sm:$0xff]   ;;  %v750_v4 = vld [vmem:[#allocation2 + $0x8] sm:$0xff]   ;;  %v751_v5 = vld [vmem:[#allocation2 + $0x10] sm:$0xff]   ;;  %vm568_vm2 = vcmask 15360  }
  0x14   :  { %662 = vmatprep.subr.bf16.mxu1 %v816_v0  ;;  %678 = vmatprep.mubr.msk.bf16.mxu1 %vm817_vm0, %v816_v0  ;;  %v749_v3 = vld [vmem:[#allocation2] sm:$0xff]   ;;  %v752_v6 = vld [vmem:[#allocation2 + $0x18] sm:$0xff]   ;;  %v754_v8 = vld [vmem:[#allocation2 + $0x28] sm:$0xff]  }
  0x15   :  { %657 = vmatpush3.bf16.msra.mxu0 %v747_v1  ;;  %663 = vmatpush3.bf16.msra.mxu1 %v749_v3  ;;  %v753_v7 = vld [vmem:[#allocation2 + $0x20] sm:$0xff]   ;;  %v755_v9 = vld [vmem:[#allocation2 + $0x30] sm:$0xff]   ;;  %v756_v10 = vld [vmem:[#allocation2 + $0x38] sm:$0xff]  }
  0x16   :  { %682 = vmatprep.subr.bf16.mxu0 %v816_v0  ;;  %664 = vmatprep.subr.bf16.mxu1 %v816_v0  ;;  %v757_v11 = vld [vmem:[#allocation2 + $0x40] sm:$0xff]   ;;  %v758_v12 = vld [vmem:[#allocation2 + $0x48] sm:$0xff]   ;;  %v759_v13 = vld [vmem:[#allocation2 + $0x50] sm:$0xff]  }
  0x17   :  { %v576_v14 = vld [vmem:[%s966_s2] ss:$0 sm:$0xff]  ;;  %v760_v23 = vld [vmem:[#allocation2 + $0x58] sm:$0xff]   ;;  %v762_v25 = vld [vmem:[#allocation2 + $0x68] sm:$0xff]  }
  0x18   :  { %659 = vmatmul.mubr.msk.bf16.vlgmr.msra.gmra.mrb[0].mxu0 %vm63_vm1, %v748_v2  ;;  %v761_v24 = vld [vmem:[#allocation2 + $0x60] sm:$0xff]   ;;  %v763_v26 = vld [vmem:[#allocation2 + $0x70] sm:$0xff]   ;;  %v764_v27 = vld [vmem:[#allocation2 + $0x78] sm:$0xff]  }
  0x19   :  { %698 = vmatprep.mubr.msk.bf16.mxu0 %vm817_vm0, %v816_v0  ;;  %665 = vmatpush3.bf16.msra.mxu1 %v750_v4  ;;  %v765_v28 = vld [vmem:[#allocation2 + $0x80] sm:$0xff]   ;;  %v766_v29 = vld [vmem:[#allocation2 + $0x88] sm:$0xff]   ;;  %v767_v30 = vld [vmem:[#allocation2 + $0x90] sm:$0xff]  }
  0x1a   :  { %666 = vmatprep.subr.bf16.mxu1 %v816_v0  ;;  %683 = vmatpush3.bf16.msra.mxu0 %v757_v11  ;;  %v580_v31 = vld [vmem:[%s968_s4] ss:$0 sm:$0xff]  ;;  %v768_v40 = vld [vmem:[#allocation2 + $0x98] sm:$0xff]   ;;  %v770_v42 = vld [vmem:[#allocation2 + $0xa8] sm:$0xff]  }
  0x1b   :  { %684 = vmatprep.subr.bf16.mxu0 %v816_v0  ;;  %v769_v41 = vld [vmem:[#allocation2 + $0xa0] sm:$0xff]   ;;  %v771_v43 = vld [vmem:[#allocation2 + $0xb0] sm:$0xff]   ;;  %v772_v44 = vld [vmem:[#allocation2 + $0xb8] sm:$0xff]  }
  0x1c   :  { %v773_v45 = vld [vmem:[%s969_s5] sm:$0xff]   ;;  %v774_v46 = vld [vmem:[%s969_s5 + $0x8] sm:$0xff]   ;;  %v775_v47 = vld [vmem:[%s969_s5 + $0x10] sm:$0xff]  }
  0x1d   :  { %667 = vmatpush3.bf16.msra.mxu1 %v751_v5  ;;  %v590_v48 = vld [vmem:[%s968_s4 + $0x1] ss:$0 sm:$0xff]  ;;  %v776_v57 = vld [vmem:[%s969_s5 + $0x18] sm:$0xff]   ;;  %v778_v59 = vld [vmem:[%s969_s5 + $0x28] sm:$0xff]  }
  0x1e   :  { %668 = vmatprep.subr.bf16.mxu1 %v816_v0  ;;  %685 = vmatpush3.bf16.msra.mxu0 %v758_v12  ;;  %v777_v58 = vld [vmem:[%s969_s5 + $0x20] sm:$0xff]   ;;  %v779_v60 = vld [vmem:[%s969_s5 + $0x30] sm:$0xff]   ;;  %v780_v61 = vld [vmem:[%s969_s5 + $0x38] sm:$0xff]  }
  0x1f   :  { %686 = vmatprep.subr.bf16.mxu0 %v816_v0  ;;  %v600_v62 = vld [vmem:[%s968_s4 + $0x2] ss:$0 sm:$0xff] }
  0x21   :  { %669 = vmatpush3.bf16.msra.mxu1 %v752_v6 }
  0x22   :  { %670 = vmatprep.subr.bf16.mxu1 %v816_v0  ;;  %687 = vmatpush3.bf16.msra.mxu0 %v759_v13 }
  0x23   :  { %688 = vmatprep.subr.bf16.mxu0 %v816_v0 }
  0x25   :  { %671 = vmatpush3.bf16.msra.mxu1 %v753_v7 }
  0x26   :  { %672 = vmatprep.subr.bf16.mxu1 %v816_v0  ;;  %689 = vmatpush3.bf16.msra.mxu0 %v760_v23 }
  0x27   :  { %690 = vmatprep.subr.bf16.mxu0 %v816_v0 }
  0x29   :  { %673 = vmatpush3.bf16.msra.mxu1 %v754_v8  ;;  %v609_v8 = vld [vmem:[%s970_s6] ss:$0 sm:$0xff] }
  0x2a   :  { %674 = vmatprep.subr.bf16.mxu1 %v816_v0  ;;  %691 = vmatpush3.bf16.msra.mxu0 %v761_v24 }
  0x2b   :  { %692 = vmatprep.subr.bf16.mxu0 %v816_v0 }
  0x2d   :  { %675 = vmatpush3.bf16.msra.mxu1 %v755_v9 }
  0x2e   :  { %676 = vmatprep.subr.bf16.mxu1 %v816_v0  ;;  %693 = vmatpush3.bf16.msra.mxu0 %v762_v25 }
  0x2f   :  { %694 = vmatprep.subr.bf16.mxu0 %v816_v0 }
  0x31   :  { %677 = vmatpush3.bf16.msra.mxu1 %v756_v10 }
  0x32   :  { %702 = vmatprep.subr.bf16.mxu1 %v816_v0  ;;  %695 = vmatpush3.bf16.msra.mxu0 %v763_v26 }
  0x33   :  { %696 = vmatprep.subr.bf16.mxu0 %v816_v0 }
  0x36   :  { %697 = vmatpush3.bf16.msra.mxu0 %v764_v27 }
  0x37   :  { %722 = vmatprep.subr.bf16.mxu0 %v816_v0 }
  0xeb   :  { %v101_v15 = vpop.f32.mrb[0].mxu0 }
  0xec   :  { %v660_v16 = vpop.f32.mrb[1].mxu0  ;;  %v102_v18 = vadd.f32 %v576_v14, %v101_v15 }
  0xed   :  { %v104_v17 = vpop.f32.mrb[2].mxu0 }
  0xee   :  { %v105_v19 = vadd.f32 %v576_v14, %v104_v17  ;;  %v661_v20 = vpop.f32.mrb[3].mxu0 }
  0xf0   :  { %v108_v21 = vpack.c.bf16 %v105_v19, %v102_v18 }
  0xf2   :  { %781 = vtanh.bf16 %v108_v21 }
  0xfd   :  { %v782_v22 = vpop.eup %781 }
  0xfe   :  { %679 = vmatmul.mubr.bf16.vlgmr.msra.gmra.mrb[0].mxu1 %v782_v22 }
  0xff   :  { %718 = vmatprep.mubr.msk.bf16.mxu1 %vm817_vm0, %v816_v0  ;;  %703 = vmatpush3.bf16.msra.mxu1 %v765_v28 }
 0x100   :  { %704 = vmatprep.subr.bf16.mxu1 %v816_v0 }
 0x103   :  { %705 = vmatpush3.bf16.msra.mxu1 %v766_v29 }
 0x104   :  { %706 = vmatprep.subr.bf16.mxu1 %v816_v0 }
 0x107   :  { %707 = vmatpush3.bf16.msra.mxu1 %v767_v30 }
 0x108   :  { %708 = vmatprep.subr.bf16.mxu1 %v816_v0 }
 0x10b   :  { %709 = vmatpush3.bf16.msra.mxu1 %v768_v40 }
 0x10c   :  { %710 = vmatprep.subr.bf16.mxu1 %v816_v0 }
 0x10f   :  { %711 = vmatpush3.bf16.msra.mxu1 %v769_v41 }
 0x110   :  { %712 = vmatprep.subr.bf16.mxu1 %v816_v0 }
 0x113   :  { %713 = vmatpush3.bf16.msra.mxu1 %v770_v42 }
 0x114   :  { %714 = vmatprep.subr.bf16.mxu1 %v816_v0 }
 0x117   :  { %715 = vmatpush3.bf16.msra.mxu1 %v771_v43 }
 0x118   :  { %716 = vmatprep.subr.bf16.mxu1 %v816_v0 }
 0x11b   :  { %717 = vmatpush3.bf16.msra.mxu1 %v772_v44 }
 0x1d1   :  { %v215_v32 = vpop.f32.mrb[0].mxu1 }
 0x1d2   :  { %v680_v33 = vpop.f32.mrb[1].mxu1  ;;  %v216_v35 = vadd.f32 %v580_v31, %v215_v32 }
 0x1d3   :  { %v218_v34 = vpop.f32.mrb[2].mxu1 }
 0x1d4   :  { %v219_v36 = vadd.f32 %v580_v31, %v218_v34  ;;  %v681_v37 = vpop.f32.mrb[3].mxu1 }
 0x1d6   :  { %v222_v38 = vpack.c.bf16 %v219_v36, %v216_v35 }
 0x1d8   :  { %783 = vtanh.bf16 %v222_v38 }
 0x1e3   :  { %v784_v39 = vpop.eup %783 }
 0x1e4   :  { %699 = vmatmul.mubr.bf16.vlgmr.msra.gmra.mrb[4].mxu0 %v784_v39 }
 0x1e5   :  { %738 = vmatprep.mubr.msk.bf16.mxu0 %vm817_vm0, %v816_v0  ;;  %723 = vmatpush3.bf16.msra.mxu0 %v773_v45 }
 0x1e6   :  { %724 = vmatprep.subr.bf16.mxu0 %v816_v0 }
 0x1e9   :  { %725 = vmatpush3.bf16.msra.mxu0 %v774_v46 }
 0x1ea   :  { %726 = vmatprep.subr.bf16.mxu0 %v816_v0 }
 0x1ed   :  { %727 = vmatpush3.bf16.msra.mxu0 %v775_v47 }
 0x1ee   :  { %728 = vmatprep.subr.bf16.mxu0 %v816_v0 }
 0x1f1   :  { %729 = vmatpush3.bf16.msra.mxu0 %v776_v57 }
 0x1f2   :  { %730 = vmatprep.subr.bf16.mxu0 %v816_v0 }
 0x1f5   :  { %731 = vmatpush3.bf16.msra.mxu0 %v777_v58 }
 0x1f6   :  { %732 = vmatprep.subr.bf16.mxu0 %v816_v0 }
 0x1f9   :  { %733 = vmatpush3.bf16.msra.mxu0 %v778_v59 }
 0x1fa   :  { %734 = vmatprep.subr.bf16.mxu0 %v816_v0 }
 0x1fd   :  { %735 = vmatpush3.bf16.msra.mxu0 %v779_v60 }
 0x1fe   :  { %736 = vmatprep.subr.bf16.mxu0 %v816_v0 }
 0x201   :  { %737 = vmatpush3.bf16.msra.mxu0 %v780_v61 }
 0x2b7   :  { %v331_v49 = vpop.f32.mrb[4].mxu0 }
 0x2b8   :  { %v700_v50 = vpop.f32.mrb[5].mxu0  ;;  %v332_v52 = vadd.f32 %v590_v48, %v331_v49 }
 0x2b9   :  { %v334_v51 = vpop.f32.mrb[6].mxu0 }
 0x2ba   :  { %v335_v53 = vadd.f32 %v590_v48, %v334_v51  ;;  %v701_v54 = vpop.f32.mrb[7].mxu0 }
 0x2bc   :  { %v338_v55 = vpack.c.bf16 %v335_v53, %v332_v52 }
 0x2be   :  { %785 = vtanh.bf16 %v338_v55 }
 0x2c9   :  { %v786_v56 = vpop.eup %785 }
 0x2ca   :  { %719 = vmatmul.mubr.bf16.vlgmr.msra.gmra.mrb[4].mxu1 %v786_v56 }
 0x39d   :  { %v447_v63 = vpop.f32.mrb[4].mxu1 }
 0x39e   :  { %v720_v1 = vpop.f32.mrb[5].mxu1  ;;  %v448_v3 = vadd.f32 %v600_v62, %v447_v63 }
 0x39f   :  { %v450_v2 = vpop.f32.mrb[6].mxu1 }
 0x3a0   :  { %v451_v4 = vadd.f32 %v600_v62, %v450_v2  ;;  %v721_v5 = vpop.f32.mrb[7].mxu1 }
 0x3a2   :  { %v454_v6 = vpack.c.bf16 %v451_v4, %v448_v3 }
 0x3a4   :  { %787 = vtanh.bf16 %v454_v6 }
 0x3af   :  { %v788_v7 = vpop.eup %787 }
 0x3b0   :  { %739 = vmatmul.mubr.bf16.vlgmr.msra.gmra.mrb[8].mxu0 %v788_v7 }
 0x483   :  { %v561_v0 = vpop.f32.mrb[8].mxu0 }
 0x484   :  { %v562_v9 = vadd.f32 %v609_v8, %v561_v0  ;;  %v740_v10 = vpop.f32.mrb[9].mxu0 }
 0x485   :  { %v564_v11 = vpop.f32.mrb[10].mxu0 }
 0x486   :  { %569 = vst.msk [vmem:[%s971_s7] sm:$0xff] %vm568_vm2, %v562_v9  ;;  %v565_v12 = vadd.f32 %v609_v8, %v564_v11  ;;  %v741_v13 = vpop.f32.mrb[11].mxu0 }
 0x488   :  { %570 = vst.msk [vmem:[%s971_s7 + $0x8] sm:$0xff] %vm568_vm2, %v565_v12 }
 0x489   :  { %575 = vsyncpa [#allocation3], 1 }

</bundles_post_ra>
